<compile_context>
chip_gen: v5e
topology: v5e:2x2
jax: 0.10.0
libtpu: 0.0.40
codegen_flags: <defaults>
</compile_context>

<pallas_src>
import jax
import jax.numpy as jnp
from jax.experimental import pallas as pl
from jax.experimental.pallas import tpu as pltpu

_LANES = 128          # vreg lane width — last dim of the lane-dense slab
_MAX_BLOCK_ROWS = 1024  # (1024, 128) f32 = 512 KiB/tile; 2 arrays x 2 bufs = 2 MiB


def _hybrid_kernel(x_ref, o_ref):
    # Elementwise hot path: expectation of Z-basis bit after H + RY(theta).
    # Compute in f32 (v5e has no bf16 VPU/EUP); cast back to storage dtype.
    theta = x_ref[...].astype(jnp.float32)
    y = 0.5 * (1.0 + jnp.sin(theta))
    o_ref[...] = y.astype(o_ref.dtype)


def hybrid_layer_forward(x: jax.Array) -> jax.Array:
    """Pallas forward for HybridLayer.

    x: any-shape array of rotation angles (typically (B, 1) from the preceding
    Linear(..., 1)).  Returns expectation values with the same shape/dtype.
    """
    orig_shape = x.shape
    orig_dtype = x.dtype
    n = x.size

    # ---- lane-dense repack: flatten -> pad -> (rows, 128) slab -------------
    rows = -(-n // _LANES)                 # ceil(n / 128)
    rows = max(8, ((rows + 7) // 8) * 8)   # sublane-align (multiple of 8)
    block_rows = min(rows, _MAX_BLOCK_ROWS)
    rows = ((rows + block_rows - 1) // block_rows) * block_rows  # grid-align
    padded = rows * _LANES

    flat = x.reshape(-1)
    if padded != n:
        flat = jnp.pad(flat, (0, padded - n))
    slab = flat.reshape(rows, _LANES)

    grid = (rows // block_rows,)

    out = pl.pallas_call(
        _hybrid_kernel,
        out_shape=jax.ShapeDtypeStruct((rows, _LANES), orig_dtype),
        grid=grid,
        in_specs=[pl.BlockSpec((block_rows, _LANES), lambda i: (i, 0))],
        out_specs=pl.BlockSpec((block_rows, _LANES), lambda i: (i, 0)),
        compiler_params=pltpu.CompilerParams(
            dimension_semantics=("parallel",),
        ),
        # The padded slab is a kernel-local temporary: reuse its HBM buffer
        # for the output (saves one HBM allocation + writeback DMA).
        input_output_aliases={0: 0},
    )(slab)

    # ---- unpack back to the caller's layout ---------------------------------
    return out.reshape(-1)[:n].reshape(orig_shape)


def hybrid_layer_reference(x: jax.Array) -> jax.Array:
    """Pure-JAX reference of the analytic quantum expectation."""
    return (0.5 * (1.0 + jnp.sin(x.astype(jnp.float32)))).astype(x.dtype)


if __name__ == "__main__":
    key = jax.random.PRNGKey(0)

    # Primary check: shape matching the module ((B, 1) angles from Linear(..., 1)).
    batch = 2
    x = jax.random.normal(key, (batch, 1), dtype=jnp.float32)
    y = jax.block_until_ready(hybrid_layer_forward(x))
    y_ref = hybrid_layer_reference(x)
    assert y.shape == (batch, 1)
    assert jnp.allclose(y, y_ref, atol=1e-6), (y, y_ref)

    # Secondary check: odd size exercising the pad/unpad + lane-dense repack.
    x2 = jax.random.normal(jax.random.PRNGKey(1), (257, 1), dtype=jnp.float32)
    y2 = jax.block_until_ready(hybrid_layer_forward(x2))
    assert y2.shape == (257, 1)
    assert jnp.allclose(y2, hybrid_layer_reference(x2), atol=1e-6)

    print("KERNEL_OK")
</pallas_src>

<mosaic_0001>
module attributes {stable_mosaic.version = 11 : i64} {
  func.func @_hybrid_kernel(%arg0: i32, %arg1: memref<8x128xf32, #tpu.memory_space<vmem>>, %arg2: memref<8x128xf32, #tpu.memory_space<vmem>>) attributes {dimension_semantics = [#tpu.dimension_semantics<parallel>], iteration_bounds = array<i64: 1>, scalar_prefetch = 0 : i64, scratch_operands = 0 : i64, tpu.core_type = #tpu.core_type<tc>, window_params = [{transform_indices = @transform_0, window_bounds = array<i64: 8, 128>}, {transform_indices = @transform_1, window_bounds = array<i64: 8, 128>}]} {
    %c0 = arith.constant 0 : index
    %c0_0 = arith.constant 0 : index
    %0 = vector.load %arg1[%c0, %c0_0] : memref<8x128xf32, #tpu.memory_space<vmem>>, vector<8x128xf32>
    %1 = math.sin %0 : vector<8x128xf32>
    %cst = arith.constant 1.000000e+00 : f32
    %2 = vector.broadcast %cst : f32 to vector<8x128xf32>
    %3 = arith.addf %2, %1 : vector<8x128xf32>
    %cst_1 = arith.constant 5.000000e-01 : f32
    %4 = vector.broadcast %cst_1 : f32 to vector<8x128xf32>
    %5 = arith.mulf %4, %3 : vector<8x128xf32>
    %c0_2 = arith.constant 0 : index
    %c0_3 = arith.constant 0 : index
    %6 = vector.load %arg2[%c0_2, %c0_3] : memref<8x128xf32, #tpu.memory_space<vmem>>, vector<8x128xf32>
    tpu.vector_store %arg2[%c0_2, %c0_3], %5 {strides = array<i32>} : memref<8x128xf32, #tpu.memory_space<vmem>>, vector<8x128xf32>,
    return
  }
  func.func @transform_0(%arg0: i32) -> (i32, i32) {
    %c0_i32 = arith.constant 0 : i32
    %c0_i32_0 = arith.constant 0 : i32
    return %arg0, %c0_i32 : i32, i32
  }
  func.func @transform_1(%arg0: i32) -> (i32, i32) {
    %c0_i32 = arith.constant 0 : i32
    %c0_i32_0 = arith.constant 0 : i32
    return %arg0, %c0_i32 : i32, i32
  }
}

</mosaic_0001>

<bundles_post_ra>
// kernel: tpu_custom_call.1
= control target key start
LH: loop header
LB: loop body
LE: loop exit
PB: predicated region body
PF: predicated region fallthrough
CT: control target
= control target key end

     0   :  { %6 = vsyncpa [#allocation3], 0  ;;  %s334_s0 = inlined_call_operand.hbm [shape: f32[8,128], index: 0, kind: input, shape index: {}, may-alias: {0,1}]   ;;  %s335_s1 = inlined_call_operand.hbm [shape: f32[8,128], index: 1, kind: output, shape index: {}, may-alias: {0,1}]  }
   0x1   :  { %7 = vsyncpa [#allocation4], 0  ;;  %s13_s8 = sshll.u32 %s334_s0, 4  ;;  %s263_s9 = smov [#allocation2]   ;;  %s14_s8 = int_to_ptr.hbm [resolvable:$true] %s13_s8 }
   0x2   :  { %s15_s10 = sshll.u32 %s263_s9, 4  ;;  %s16_s10 = int_to_ptr.vmem [resolvable:$true] %s15_s10 }
   0x3   :  { %18 = dma.hbm_to_vmem [thread:$0]  %s14_s8, 128, %s16_s10, [#allocation3]  }
   0x4   :  { %259 = dma.done.wait [#allocation3], 128  }
   0x5   :  { %260 = vsyncadd [#allocation3], 4294967168  ;;  %v285_v0 = vld [vmem:[#allocation2] sm:$0xff]  ;;  %v264_v12 = vmov 683565275   ;;  %s271_s0 = smov [#allocation5]  }
   0x6   :  { %v27_v1 = vand.u32 2139095040, %v285_v0  ;;  %v24_v3 = vand.u32 2147483647, %v285_v0  ;;  %v265_v14 = vmov 2475754826   ;;  %vm26_vm12 = vcmp.lt.s32.totalorder %v285_v0, 0 }
   0x7   :  { %v266_v16 = vmov 2131351028   ;;  %v267_v18 = vmov 2102212464   ;;  %v268_v20 = vmov 920167782  }
   0x8   :  { %v28_v2 = vshrl.u32 %v27_v1, 23  ;;  %v31_v6 = vand.u32 8388607, %v24_v3  ;;  %v269_v26 = vmov 1326507024   ;;  %v270_v1 = vmov 0  }
   0x9   :  { %vm25_vm13 = vcmp.le.f32.partialorder %v24_v3, 0.7853982  ;;  %s187_s11 = sshll.u32 %s271_s0, 4  ;;  %s189_s14 = sshll.u32 %s335_s1, 4  ;;  %s188_s11 = int_to_ptr.vmem [resolvable:$true] %s187_s11  ;;  %s190_s14 = int_to_ptr.hbm [resolvable:$true] %s189_s14 }
   0xa   :  { %v199_v4 = vadd.s32 4294967169, %v28_v2  ;;  %v32_v9 = vor.u32 8388608, %v31_v6 }
   0xc   :  { %v34_v5 = vadd.s32 1, %v199_v4  ;;  %v294_v28 = vshll.u32 %v32_v9, 8 }
   0xe   :  { %vm35_vm0 = vcmp.gt.s32.totalorder %v34_v5, 0  ;;  %v73_v40 = vand.u32 65535, %v294_v28  ;;  %v74_v41 = vshrl.u32 %v294_v28, 16 }
   0xf   :  { %v36_v7 = vsel %vm35_vm0, %v34_v5, 0 }
  0x10   :  { %v38_v8 = vand.u32 31, %v36_v7  ;;  %v291_v10 = vshrl.u32 %v36_v7, 5 }
  0x12   :  { %v39_v11 = vsub.s32 32, %v38_v8  ;;  %v41_v13 = vshll.u32 %v264_v12, %v38_v8  ;;  %v44_v15 = vshll.u32 %v265_v14, %v38_v8  ;;  %v47_v17 = vshll.u32 %v266_v16, %v38_v8 }
  0x13   :  { %v50_v19 = vshll.u32 %v267_v18, %v38_v8  ;;  %v53_v21 = vshll.u32 %v268_v20, %v38_v8  ;;  %vm56_vm1 = vcmp.lt.s32.totalorder %v291_v10, 1  ;;  %vm59_vm2 = vcmp.lt.s32.totalorder %v291_v10, 4 }
  0x14   :  { %v42_v22 = vshrl.u32 %v265_v14, %v39_v11  ;;  %v45_v23 = vshrl.u32 %v266_v16, %v39_v11  ;;  %v48_v24 = vshrl.u32 %v267_v18, %v39_v11  ;;  %v51_v25 = vshrl.u32 %v268_v20, %v39_v11 }
  0x15   :  { %v54_v27 = vshrl.u32 %v269_v26, %v39_v11  ;;  %vm58_vm3 = vcmp.lt.s32.totalorder %v291_v10, 3  ;;  %vm57_vm4 = vcmp.lt.s32.totalorder %v291_v10, 2  ;;  %v40_v48 = vshrl.u32 %v264_v12, %v39_v11 }
  0x16   :  { %v43_v29 = vor.u32 %v42_v22, %v41_v13  ;;  %v46_v30 = vor.u32 %v45_v23, %v44_v15  ;;  %v49_v31 = vor.u32 %v48_v24, %v47_v17  ;;  %v52_v32 = vor.u32 %v51_v25, %v50_v19 }
  0x17   :  { %v55_v33 = vor.u32 %v54_v27, %v53_v21 }
  0x18   :  { %v64_v34 = vsel %vm56_vm1, %v43_v29, %v46_v30  ;;  %v68_v35 = vsel %vm56_vm1, %v46_v30, %v49_v31  ;;  %v65_v36 = vsel %vm59_vm2, %v52_v32, 920167782  ;;  %v60_v61 = vsel %vm56_vm1, %v40_v48, %v43_v29 }
  0x19   :  { %v69_v37 = vsel %vm59_vm2, %v55_v33, 1326507024  ;;  %v66_v38 = vsel %vm58_vm3, %v49_v31, %v65_v36  ;;  %v61_v63 = vsel %vm59_vm2, %v49_v31, 2102212464  ;;  %vm167_vm1 = vweird.f32 %v285_v0 }
  0x1a   :  { %v70_v39 = vsel %vm58_vm3, %v52_v32, %v69_v37  ;;  %v67_v42 = vsel %vm57_vm4, %v64_v34, %v66_v38  ;;  %v62_v12 = vsel %vm58_vm3, %v46_v30, %v61_v63 }
  0x1b   :  { %v71_v43 = vsel %vm57_vm4, %v68_v35, %v70_v39  ;;  %v97_v46 = vand.u32 65535, %v67_v42  ;;  %v98_v47 = vshrl.u32 %v67_v42, 16  ;;  %v63_v20 = vsel %vm57_vm4, %v60_v61, %v62_v12 }
  0x1c   :  { %v75_v44 = vand.u32 65535, %v71_v43  ;;  %v76_v45 = vshrl.u32 %v71_v43, 16  ;;  %v117_v24 = vmul.u32 %v294_v28, %v63_v20 }
  0x1d   :  { %v99_v52 = vmul.u32 %v97_v46, %v73_v40  ;;  %v100_v53 = vmul.u32 %v98_v47, %v73_v40  ;;  %v101_v54 = vmul.u32 %v97_v46, %v74_v41  ;;  %v102_v58 = vmul.u32 %v98_v47, %v74_v41 }
  0x1e   :  { %v77_v49 = vmul.u32 %v75_v44, %v73_v40  ;;  %v78_v50 = vmul.u32 %v76_v45, %v73_v40  ;;  %v79_v51 = vmul.u32 %v75_v44, %v74_v41  ;;  %v80_v55 = vmul.u32 %v76_v45, %v74_v41 }
  0x1f   :  { %v103_v59 = vshll.u32 %v100_v53, 16  ;;  %v105_v60 = vshll.u32 %v101_v54, 16  ;;  %v104_v9 = vshrl.u32 %v100_v53, 16  ;;  %v106_v16 = vshrl.u32 %v101_v54, 16 }
  0x20   :  { %v81_v56 = vshll.u32 %v78_v50, 16  ;;  %v83_v57 = vshll.u32 %v79_v51, 16  ;;  %v82_v5 = vshrl.u32 %v78_v50, 16  ;;  %v84_v13 = vshrl.u32 %v79_v51, 16 }
  0x21   :  { %vm107_vm6 = vc.u32 %v99_v52, %v103_v59  ;;  %v109_v4 = vadd.s32 %v103_v59, %v99_v52 }
  0x22   :  { %vm85_vm5 = vc.u32 %v77_v49, %v81_v56  ;;  %v87_v62 = vadd.s32 %v81_v56, %v77_v49  ;;  %v108_v7 = vsel %vm107_vm6, 1, %v270_v1 }
  0x23   :  { %v86_v2 = vsel %vm85_vm5, 1, %v270_v1  ;;  %v110_v11 = vadd.s32 %v108_v7, %v102_v58  ;;  %vm111_vm8 = vc.u32 %v109_v4, %v105_v60  ;;  %v113_v19 = vadd.s32 %v109_v4, %v105_v60 }
  0x24   :  { %v88_v6 = vadd.s32 %v86_v2, %v80_v55  ;;  %vm89_vm7 = vc.u32 %v87_v62, %v83_v57  ;;  %v112_v15 = vsel %vm111_vm8, 1, %v270_v1 }
  0x25   :  { %v90_v8 = vsel %vm89_vm7, 1, %v270_v1  ;;  %v114_v17 = vadd.s32 %v112_v15, %v110_v11 }
  0x26   :  { %v92_v14 = vadd.s32 %v90_v8, %v88_v6 }
  0x27   :  { %v115_v21 = vadd.s32 %v114_v17, %v104_v9 }
  0x28   :  { %v93_v18 = vadd.s32 %v92_v14, %v82_v5 }
  0x29   :  { %v116_v23 = vadd.s32 %v115_v21, %v106_v16 }
  0x2a   :  { %v94_v22 = vadd.s32 %v93_v18, %v84_v13 }
  0x2b   :  { %v120_v25 = vadd.s32 1, %v116_v23 }
  0x2c   :  { %vm119_vm9 = vc.u32 %v94_v22, %v113_v19  ;;  %v118_v10 = vadd.s32 %v113_v19, %v94_v22 }
  0x2d   :  { %v121_v26 = vsel %vm119_vm9, %v120_v25, %v116_v23 }
  0x2e   :  { %v122_v27 = vadd.s32 %v121_v26, %v117_v24 }
  0x30   :  { %v123_v29 = vadd.s32 536870912, %v122_v27 }
  0x32   :  { %v124_v30 = vshrl.u32 %v123_v29, 30 }
  0x34   :  { %v125_v31 = vshll.u32 %v124_v30, 30  ;;  %v148_v48 = vsub.s32 4, %v124_v30 }
  0x36   :  { %v126_v32 = vsub.s32 %v122_v27, %v125_v31  ;;  %v149_v51 = vsel %vm26_vm12, %v148_v48, %v124_v30 }
  0x37   :  { %v151_v54 = vsel %vm25_vm13, 0, %v149_v51 }
  0x38   :  { %vm127_vm10 = vcmp.lt.s32.totalorder %v126_v32, 0  ;;  %v128_v33 = vsub.s32 0, %v126_v32  ;;  %v168_v59 = vadd.s32 3, %v151_v54 }
  0x3a   :  { %v129_v34 = vsel %vm127_vm10, %v128_v33, %v126_v32  ;;  %v169_v1 = vand.u32 3, %v168_v59 }
  0x3b   :  { %v130_v35 = vclz %v129_v34 }
  0x3c   :  { %vm174_vm14 = vcmp.eq.s32.totalorder %v169_v1, 2  ;;  %vm171_vm15 = vcmp.eq.s32.totalorder %v169_v1, 0  ;;  %vm170_vm0 = vcmp.lt.s32.totalorder %v169_v1, 2 }
  0x3d   :  { %v200_v36 = vadd.s32 4294967294, %v130_v35 }
  0x3f   :  { %vm201_vm11 = vcmp.lt.s32.totalorder %v200_v36, 0 }
  0x40   :  { %v133_v37 = vsel %vm201_vm11, 0, %v200_v36 }
  0x41   :  { %v134_v38 = vsub.s32 32, %v133_v37  ;;  %v135_v39 = vshll.u32 %v126_v32, %v133_v37  ;;  %v138_v40 = vsub.s32 4294967266, %v133_v37 }
  0x43   :  { %v136_v28 = vshrl.u32 %v118_v10, %v134_v38  ;;  %v139_v41 = vadd.s32 127, %v138_v40 }
  0x45   :  { %v137_v42 = vor.u32 %v136_v28, %v135_v39  ;;  %v140_v43 = vshll.u32 %v139_v41, 23 }
  0x47   :  { %v141_v44 = vor.u32 4788187, %v140_v43  ;;  %v144_v45 = vcvt.s32.f32 %v137_v42 }
  0x49   :  { %v142_v46 = vand.u32 2147483647, %v141_v44 }
  0x4b   :  { %v145_v47 = vmul.f32 %v144_v45, %v142_v46 }
  0x4d   :  { %v146_v49 = vxor.u32 2147483648, %v145_v47 }
  0x4f   :  { %v147_v50 = vsel %vm26_vm12, %v146_v49, %v145_v47 }
  0x50   :  { %v150_v52 = vsel %vm25_vm13, %v285_v0, %v147_v50 }
  0x51   :  { %v152_v53 = vmul.f32 %v150_v52, %v150_v52 }
  0x53   :  { %v153_v55 = vmul.f32 -0.001358992, %v152_v53  ;;  %v160_v56 = vmul.f32 -0.00019511016, %v152_v53 }
  0x55   :  { %v154_v57 = vadd.f32 0.041655596, %v153_v55  ;;  %v161_v58 = vadd.f32 0.008332121, %v160_v56 }
  0x57   :  { %v155_v60 = vmul.f32 %v154_v57, %v152_v53  ;;  %v162_v61 = vmul.f32 %v161_v58, %v152_v53 }
  0x59   :  { %v156_v62 = vadd.f32 -0.4999988, %v155_v60  ;;  %v163_v63 = vadd.f32 -0.16666654, %v162_v61 }
  0x5b   :  { %v157_v2 = vmul.f32 %v156_v62, %v152_v53  ;;  %v164_v4 = vmul.f32 %v163_v63, %v152_v53 }
  0x5d   :  { %v158_v3 = vadd.f32 1.0, %v157_v2  ;;  %v165_v5 = vadd.f32 1.0, %v164_v4 }
  0x5f   :  { %v166_v6 = vmul.f32 %v165_v5, %v150_v52  ;;  %v175_v7 = vxor.u32 2147483648, %v158_v3 }
  0x61   :  { %v172_v8 = vxor.u32 2147483648, %v166_v6  ;;  %v176_v9 = vsel %vm174_vm14, %v175_v7, %v166_v6 }
  0x63   :  { %v173_v11 = vsel %vm171_vm15, %v158_v3, %v172_v8 }
  0x64   :  { %v177_v12 = vsel %vm170_vm0, %v173_v11, %v176_v9 }
  0x65   :  { %v178_v13 = vsel %vm167_vm1, nan, %v177_v12 }
  0x66   :  { %v179_v14 = vadd.f32 1.0, %v178_v13 }
  0x68   :  { %v180_v15 = vmul.f32 0.5, %v179_v14 }
  0x6a   :  { %181 = vst [vmem:[#allocation5] sm:$0xff] %v180_v15 }
  0x6b   :  { %192 = dma.vmem_to_hbm [thread:$0]  %s188_s11, 128, %s190_s14, [#allocation4]  }
  0x6c   :  { %261 = dma.done.wait [#allocation4], 128  }
  0x6d   :  { %262 = vsyncadd [#allocation4], 4294967168 }
  0x6e   :  { %197 = vsyncpa [#allocation3], 1 }
  0x6f   :  { %198 = vsyncpa [#allocation4], 1 }

</bundles_post_ra>
